<compile_context>
chip_gen: v7x
topology: tpu7x:2x2x1
jax: 0.10.0
libtpu: 0.0.40
codegen_flags: <defaults>
</compile_context>

<pallas_src>
import functools
import math

import jax
import jax.numpy as jnp
from jax import lax
from jax.experimental import pallas as pl
from jax.experimental.pallas import tpu as pltpu


def _round_up(x, m):
    return ((x + m - 1) // m) * m


def _poisson_backward_kernel(x_ref, w1t_ref, b1t_ref, w2t_ref, b2t_ref,
                             w3t_ref, b3t_ref, g_ref, z_ref, logits_ref,
                             *, tau, sample_size):
    """One grid step = one tile of TILE_N rows.

    Transposed (feature, rows) layout: every block's last dim is TILE_N
    (lane-dense); the K categorical classes live on the sublane axis.
    """
    # ---- MLP (once per row tile) ----
    # Linear(1, D): contraction dim is 1 -> VPU broadcast multiply, no MXU.
    h = w1t_ref[...] * x_ref[...] + b1t_ref[...]                      # (D, TILE_N)
    h = jnp.maximum(h, 0.0)
    # TODO(synk): nn.Dropout(0.5) layers use eval-mode (identity) semantics.
    h = jnp.dot(w2t_ref[...], h,
                preferred_element_type=jnp.float32) + b2t_ref[...]    # (D, TILE_N)
    h = jnp.maximum(h, 0.0)
    h = jnp.dot(w3t_ref[...], h,
                preferred_element_type=jnp.float32) + b3t_ref[...]    # (K, TILE_N)

    # ---- log_softmax over K (sublane axis) ----
    m = jnp.max(h, axis=0, keepdims=True)                             # (1, TILE_N)
    lse = jnp.log(jnp.sum(jnp.exp(h - m), axis=0, keepdims=True)) + m
    logits = h - lse                                                  # exact log-probs
    logits_ref[...] = logits

    # ---- Gumbel-softmax samples: hot loop is add/max/exp/sum/mul only ----
    inv_tau = 1.0 / tau
    logits_scaled = logits * inv_tau                                  # hoisted

    def one_sample(s, acc):
        y = logits_scaled + g_ref[s] * inv_tau                        # (K, TILE_N)
        ym = jnp.max(y, axis=0, keepdims=True)
        e = jnp.exp(y - ym)
        denom = jnp.sum(e, axis=0, keepdims=True)                     # (1, TILE_N)
        return acc + e * (1.0 / denom)       # exact normalize: z rows sum to 1

    acc = jnp.zeros_like(logits)
    if sample_size <= 8:                     # static unroll for small S
        for s in range(sample_size):
            acc = one_sample(s, acc)
    else:
        acc = lax.fori_loop(0, sample_size, one_sample, acc)

    z_ref[...] = acc if sample_size == 1 else acc * (1.0 / sample_size)


def init_params(key, D, K):
    """Deterministic synthetic parameters: Linear(1,D), Linear(D,D), Linear(D,K)."""
    k1, k2, k3, k4, k5, k6 = jax.random.split(key, 6)
    w1 = jax.random.normal(k1, (1, D), jnp.float32) * 0.5
    b1 = jax.random.normal(k2, (1, D), jnp.float32) * 0.1
    w2 = jax.random.normal(k3, (D, D), jnp.float32) * (1.0 / math.sqrt(D))
    b2 = jax.random.normal(k4, (1, D), jnp.float32) * 0.1
    w3 = jax.random.normal(k5, (D, K), jnp.float32) * (1.0 / math.sqrt(D))
    b3 = jax.random.normal(k6, (1, K), jnp.float32) * 0.1
    return (w1, b1, w2, b2, w3, b3)


def poisson_backward(x, params, noise_key, tau, sample_size=1, tile_n=1024):
    """Returns (z, logits) matching PoissonBackward.forward (eval-mode dropout)."""
    w1, b1, w2, b2, w3, b3 = params
    D = w1.shape[1]
    K = w3.shape[1]

    orig_lead = x.shape[:-1]
    assert x.shape[-1] == 1, "PoissonBackward expects a trailing feature dim of 1"
    N = int(math.prod(orig_lead)) if orig_lead else 1

    # Lane-dense transposed layout: rows live on the lane (last, 128-wide) axis.
    tile_n = max(128, _round_up(tile_n, 128))
    N128 = _round_up(N, 128)
    TILE_N = min(tile_n, N128)
    if TILE_N == N128 and N128 > 128:
        # Prefer >= 2 row tiles so both v7x TensorCores get work (harmless elsewhere).
        TILE_N = _round_up(N128 // 2, 128)
    N_pad = _round_up(N128, TILE_N)
    n_tiles = N_pad // TILE_N

    x_t = jnp.zeros((1, N_pad), jnp.float32).at[0, :N].set(
        x.reshape(-1).astype(jnp.float32))

    # Transposed parameters: h_t = W^T @ x_t + b^T, biases as (out, 1) columns.
    w1t = jnp.transpose(w1).astype(jnp.float32)        # (D, 1)
    b1t = jnp.reshape(b1, (D, 1)).astype(jnp.float32)
    w2t = jnp.transpose(w2).astype(jnp.float32)        # (D, D)
    b2t = jnp.reshape(b2, (D, 1)).astype(jnp.float32)
    w3t = jnp.transpose(w3).astype(jnp.float32)        # (K, D)
    b3t = jnp.reshape(b3, (K, 1)).astype(jnp.float32)

    # Gumbel(0,1) noise, drawn once (TPU- and interpret-safe), already lane-dense.
    g = jax.random.gumbel(noise_key, (sample_size, K, N_pad), jnp.float32)

    kernel = functools.partial(_poisson_backward_kernel,
                               tau=float(tau), sample_size=int(sample_size))

    z_t, logits_t = pl.pallas_call(
        kernel,
        out_shape=(jax.ShapeDtypeStruct((K, N_pad), jnp.float32),
                   jax.ShapeDtypeStruct((K, N_pad), jnp.float32)),
        grid_spec=pltpu.PrefetchScalarGridSpec(
            num_scalar_prefetch=0,
            grid=(n_tiles,),
            in_specs=[
                pl.BlockSpec((1, TILE_N), lambda i: (0, i)),                  # x rows
                pl.BlockSpec((D, 1), lambda i: (0, 0)),                       # w1^T
                pl.BlockSpec((D, 1), lambda i: (0, 0)),                       # b1^T
                pl.BlockSpec((D, D), lambda i: (0, 0)),                       # w2^T
                pl.BlockSpec((D, 1), lambda i: (0, 0)),                       # b2^T
                pl.BlockSpec((K, D), lambda i: (0, 0)),                       # w3^T
                pl.BlockSpec((K, 1), lambda i: (0, 0)),                       # b3^T
                pl.BlockSpec((sample_size, K, TILE_N), lambda i: (0, 0, i)),  # gumbel
            ],
            out_specs=[
                pl.BlockSpec((K, TILE_N), lambda i: (0, i)),                  # z
                pl.BlockSpec((K, TILE_N), lambda i: (0, i)),                  # logits
            ],
        ),
        compiler_params=pltpu.CompilerParams(
            dimension_semantics=("parallel",)),
    )(x_t, w1t, b1t, w2t, b2t, w3t, b3t, g)

    z = jnp.transpose(z_t)[:N]          # (N, K)
    logits = jnp.transpose(logits_t)[:N]
    out_shape = orig_lead + (K,)
    return z.reshape(out_shape), logits.reshape(out_shape)


if __name__ == "__main__":
    D, K, tau = 32, 8, 0.5
    B, S = 2, 8                      # x: (batch=2, seq=8, 1)

    key = jax.random.PRNGKey(0)
    pkey, xkey, nkey = jax.random.split(key, 3)

    params = init_params(pkey, D, K)
    x = jax.random.normal(xkey, (B, S, 1), jnp.float32)

    z, logits = poisson_backward(x, params, nkey, tau, sample_size=1)
    jax.block_until_ready((z, logits))

    assert z.shape == (B, S, K) and logits.shape == (B, S, K)

    # Pure-JAX reference for the deterministic part (MLP + log_softmax).
    w1, b1, w2, b2, w3, b3 = params
    x2 = x.reshape(-1, 1)
    hp = jnp.maximum(jnp.dot(x2, w1, precision=lax.Precision.HIGHEST) + b1, 0.0)
    hp = jnp.maximum(jnp.dot(hp, w2, precision=lax.Precision.HIGHEST) + b2, 0.0)
    hp = jnp.dot(hp, w3, precision=lax.Precision.HIGHEST) + b3
    logits_ref = jax.nn.log_softmax(hp, axis=-1).reshape(B, S, K)
    assert bool(jnp.allclose(logits, logits_ref, atol=1e-3, rtol=1e-3))
    assert bool(jnp.allclose(jax.scipy.special.logsumexp(logits, axis=-1), 0.0,
                             atol=1e-4))

    # z rows are (means of) softmaxes -> sum to 1; everything finite.
    assert bool(jnp.allclose(jnp.sum(z, axis=-1), 1.0, atol=1e-4))
    assert bool(jnp.all(jnp.isfinite(z))) and bool(jnp.all(jnp.isfinite(logits)))

    # Also exercise the sample_size > 1 path (mean of relaxed samples).
    z4, logits4 = poisson_backward(x, params, nkey, tau, sample_size=4)
    jax.block_until_ready((z4, logits4))
    assert bool(jnp.allclose(jnp.sum(z4, axis=-1), 1.0, atol=1e-4))
    assert bool(jnp.allclose(logits4, logits, atol=1e-5))   # logits independent of S

    print("KERNEL_OK")
</pallas_src>

<mosaic_0001>
module attributes {stable_mosaic.version = 11 : i64} {
  func.func @_poisson_backward_kernel(%arg0: i32, %arg1: memref<1x128xf32, #tpu.memory_space<vmem>>, %arg2: memref<32x1xf32, #tpu.memory_space<vmem>>, %arg3: memref<32x1xf32, #tpu.memory_space<vmem>>, %arg4: memref<32x32xf32, #tpu.memory_space<vmem>>, %arg5: memref<32x1xf32, #tpu.memory_space<vmem>>, %arg6: memref<8x32xf32, #tpu.memory_space<vmem>>, %arg7: memref<8x1xf32, #tpu.memory_space<vmem>>, %arg8: memref<1x8x128xf32, #tpu.memory_space<vmem>>, %arg9: memref<8x128xf32, #tpu.memory_space<vmem>>, %arg10: memref<8x128xf32, #tpu.memory_space<vmem>>) attributes {dimension_semantics = [#tpu.dimension_semantics<parallel>], iteration_bounds = array<i64: 1>, scalar_prefetch = 0 : i64, scratch_operands = 0 : i64, tpu.core_type = #tpu.core_type<tc>, window_params = [{transform_indices = @transform_0, window_bounds = array<i64: 1, 128>}, {pipeline_mode = #tpu.pipeline_mode<synchronous>, transform_indices = @transform_1, window_bounds = array<i64: 32, 1>}, {pipeline_mode = #tpu.pipeline_mode<synchronous>, transform_indices = @transform_2, window_bounds = array<i64: 32, 1>}, {pipeline_mode = #tpu.pipeline_mode<synchronous>, transform_indices = @transform_3, window_bounds = array<i64: 32, 32>}, {pipeline_mode = #tpu.pipeline_mode<synchronous>, transform_indices = @transform_4, window_bounds = array<i64: 32, 1>}, {pipeline_mode = #tpu.pipeline_mode<synchronous>, transform_indices = @transform_5, window_bounds = array<i64: 8, 32>}, {pipeline_mode = #tpu.pipeline_mode<synchronous>, transform_indices = @transform_6, window_bounds = array<i64: 8, 1>}, {transform_indices = @transform_7, window_bounds = array<i64: 1, 8, 128>}, {transform_indices = @transform_8, window_bounds = array<i64: 8, 128>}, {transform_indices = @transform_9, window_bounds = array<i64: 8, 128>}]} {
    %c0 = arith.constant 0 : index
    %c0_0 = arith.constant 0 : index
    %0 = vector.load %arg2[%c0, %c0_0] : memref<32x1xf32, #tpu.memory_space<vmem>>, vector<32x1xf32>
    %c0_1 = arith.constant 0 : index
    %c0_2 = arith.constant 0 : index
    %1 = vector.load %arg1[%c0_1, %c0_2] : memref<1x128xf32, #tpu.memory_space<vmem>>, vector<1x128xf32>
    %2 = vector.broadcast %0 : vector<32x1xf32> to vector<32x128xf32>
    %3 = vector.broadcast %1 : vector<1x128xf32> to vector<32x128xf32>
    %4 = arith.mulf %2, %3 : vector<32x128xf32>
    %c0_3 = arith.constant 0 : index
    %c0_4 = arith.constant 0 : index
    %5 = vector.load %arg3[%c0_3, %c0_4] : memref<32x1xf32, #tpu.memory_space<vmem>>, vector<32x1xf32>
    %6 = vector.broadcast %5 : vector<32x1xf32> to vector<32x128xf32>
    %7 = arith.addf %4, %6 : vector<32x128xf32>
    %cst = arith.constant 0.000000e+00 : f32
    %8 = vector.broadcast %cst : f32 to vector<32x128xf32>
    %9 = arith.maximumf %7, %8 : vector<32x128xf32>
    %c0_5 = arith.constant 0 : index
    %c0_6 = arith.constant 0 : index
    %10 = vector.load %arg4[%c0_5, %c0_6] : memref<32x32xf32, #tpu.memory_space<vmem>>, vector<32x32xf32>
    %cst_7 = arith.constant dense<0.000000e+00> : vector<32x128xf32>
    %11 = tpu.matmul %10, %9, %cst_7 {dimension_numbers = #tpu.dot_dimension_numbers<[1], [0], [0], [1], [0, 0, 1, 1], [], []>} : vector<32x32xf32>, vector<32x128xf32>, vector<32x128xf32> -> vector<32x128xf32>
    %c0_8 = arith.constant 0 : index
    %c0_9 = arith.constant 0 : index
    %12 = vector.load %arg5[%c0_8, %c0_9] : memref<32x1xf32, #tpu.memory_space<vmem>>, vector<32x1xf32>
    %13 = vector.broadcast %12 : vector<32x1xf32> to vector<32x128xf32>
    %14 = arith.addf %11, %13 : vector<32x128xf32>
    %cst_10 = arith.constant 0.000000e+00 : f32
    %15 = vector.broadcast %cst_10 : f32 to vector<32x128xf32>
    %16 = arith.maximumf %14, %15 : vector<32x128xf32>
    %c0_11 = arith.constant 0 : index
    %c0_12 = arith.constant 0 : index
    %17 = vector.load %arg6[%c0_11, %c0_12] : memref<8x32xf32, #tpu.memory_space<vmem>>, vector<8x32xf32>
    %cst_13 = arith.constant dense<0.000000e+00> : vector<8x128xf32>
    %18 = tpu.matmul %17, %16, %cst_13 {dimension_numbers = #tpu.dot_dimension_numbers<[1], [0], [0], [1], [0, 0, 1, 1], [], []>} : vector<8x32xf32>, vector<32x128xf32>, vector<8x128xf32> -> vector<8x128xf32>
    %c0_14 = arith.constant 0 : index
    %c0_15 = arith.constant 0 : index
    %19 = vector.load %arg7[%c0_14, %c0_15] : memref<8x1xf32, #tpu.memory_space<vmem>>, vector<8x1xf32>
    %20 = vector.broadcast %19 : vector<8x1xf32> to vector<8x128xf32>
    %21 = arith.addf %18, %20 : vector<8x128xf32>
    %cst_16 = arith.constant dense<0xFF800000> : vector<128xf32>
    %22 = vector.multi_reduction <maximumf>, %21, %cst_16 [0] : vector<8x128xf32> to vector<128xf32>
    %23 = vector.shape_cast %22 : vector<128xf32> to vector<1x128xf32>
    %24 = vector.broadcast %23 : vector<1x128xf32> to vector<8x128xf32>
    %25 = arith.subf %21, %24 : vector<8x128xf32>
    %26 = math.exp %25 : vector<8x128xf32>
    %cst_17 = arith.constant dense<0.000000e+00> : vector<128xf32>
    %27 = vector.multi_reduction <add>, %26, %cst_17 [0] : vector<8x128xf32> to vector<128xf32>
    %28 = vector.shape_cast %27 : vector<128xf32> to vector<1x128xf32>
    %29 = math.log %28 : vector<1x128xf32>
    %30 = arith.addf %29, %23 : vector<1x128xf32>
    %31 = vector.broadcast %30 : vector<1x128xf32> to vector<8x128xf32>
    %32 = arith.subf %21, %31 : vector<8x128xf32>
    %c0_18 = arith.constant 0 : index
    %c0_19 = arith.constant 0 : index
    %33 = vector.load %arg10[%c0_18, %c0_19] : memref<8x128xf32, #tpu.memory_space<vmem>>, vector<8x128xf32>
    tpu.vector_store %arg10[%c0_18, %c0_19], %32 {strides = array<i32>} : memref<8x128xf32, #tpu.memory_space<vmem>>, vector<8x128xf32>,
    %cst_20 = arith.constant 2.000000e+00 : f32
    %34 = vector.broadcast %cst_20 : f32 to vector<8x128xf32>
    %35 = arith.mulf %32, %34 : vector<8x128xf32>
    %cst_21 = arith.constant 0.000000e+00 : f32
    %36 = vector.broadcast %cst_21 : f32 to vector<8x128xf32>
    %c0_22 = arith.constant 0 : index
    %c0_23 = arith.constant 0 : index
    %c0_24 = arith.constant 0 : index
    %37 = vector.load %arg8[%c0_22, %c0_23, %c0_24] : memref<1x8x128xf32, #tpu.memory_space<vmem>>, vector<1x8x128xf32>
    %38 = vector.shape_cast %37 : vector<1x8x128xf32> to vector<8x128xf32>
    %cst_25 = arith.constant 2.000000e+00 : f32
    %39 = vector.broadcast %cst_25 : f32 to vector<8x128xf32>
    %40 = arith.mulf %38, %39 : vector<8x128xf32>
    %41 = arith.addf %35, %40 : vector<8x128xf32>
    %cst_26 = arith.constant dense<0xFF800000> : vector<128xf32>
    %42 = vector.multi_reduction <maximumf>, %41, %cst_26 [0] : vector<8x128xf32> to vector<128xf32>
    %43 = vector.shape_cast %42 : vector<128xf32> to vector<1x128xf32>
    %44 = vector.broadcast %43 : vector<1x128xf32> to vector<8x128xf32>
    %45 = arith.subf %41, %44 : vector<8x128xf32>
    %46 = math.exp %45 : vector<8x128xf32>
    %cst_27 = arith.constant dense<0.000000e+00> : vector<128xf32>
    %47 = vector.multi_reduction <add>, %46, %cst_27 [0] : vector<8x128xf32> to vector<128xf32>
    %48 = vector.shape_cast %47 : vector<128xf32> to vector<1x128xf32>
    %cst_28 = arith.constant 1.000000e+00 : f32
    %49 = vector.broadcast %cst_28 : f32 to vector<1x128xf32>
    %50 = arith.divf %49, %48 : vector<1x128xf32>
    %51 = vector.broadcast %50 : vector<1x128xf32> to vector<8x128xf32>
    %52 = arith.mulf %46, %51 : vector<8x128xf32>
    %53 = arith.addf %36, %52 : vector<8x128xf32>
    %c0_29 = arith.constant 0 : index
    %c0_30 = arith.constant 0 : index
    %54 = vector.load %arg9[%c0_29, %c0_30] : memref<8x128xf32, #tpu.memory_space<vmem>>, vector<8x128xf32>
    tpu.vector_store %arg9[%c0_29, %c0_30], %53 {strides = array<i32>} : memref<8x128xf32, #tpu.memory_space<vmem>>, vector<8x128xf32>,
    return
  }
  func.func @transform_0(%arg0: i32) -> (i32, i32) {
    %c0_i32 = arith.constant 0 : i32
    %c0_i32_0 = arith.constant 0 : i32
    return %c0_i32, %arg0 : i32, i32
  }
  func.func @transform_1(%arg0: i32) -> (i32, i32) {
    %c0_i32 = arith.constant 0 : i32
    %c0_i32_0 = arith.constant 0 : i32
    %c0_i32_1 = arith.constant 0 : i32
    return %c0_i32, %c0_i32_0 : i32, i32
  }
  func.func @transform_2(%arg0: i32) -> (i32, i32) {
    %c0_i32 = arith.constant 0 : i32
    %c0_i32_0 = arith.constant 0 : i32
    %c0_i32_1 = arith.constant 0 : i32
    return %c0_i32, %c0_i32_0 : i32, i32
  }
  func.func @transform_3(%arg0: i32) -> (i32, i32) {
    %c0_i32 = arith.constant 0 : i32
    %c0_i32_0 = arith.constant 0 : i32
    %c0_i32_1 = arith.constant 0 : i32
    return %c0_i32, %c0_i32_0 : i32, i32
  }
  func.func @transform_4(%arg0: i32) -> (i32, i32) {
    %c0_i32 = arith.constant 0 : i32
    %c0_i32_0 = arith.constant 0 : i32
    %c0_i32_1 = arith.constant 0 : i32
    return %c0_i32, %c0_i32_0 : i32, i32
  }
  func.func @transform_5(%arg0: i32) -> (i32, i32) {
    %c0_i32 = arith.constant 0 : i32
    %c0_i32_0 = arith.constant 0 : i32
    %c0_i32_1 = arith.constant 0 : i32
    return %c0_i32, %c0_i32_0 : i32, i32
  }
  func.func @transform_6(%arg0: i32) -> (i32, i32) {
    %c0_i32 = arith.constant 0 : i32
    %c0_i32_0 = arith.constant 0 : i32
    %c0_i32_1 = arith.constant 0 : i32
    return %c0_i32, %c0_i32_0 : i32, i32
  }
  func.func @transform_7(%arg0: i32) -> (i32, i32, i32) {
    %c0_i32 = arith.constant 0 : i32
    %c0_i32_0 = arith.constant 0 : i32
    %c0_i32_1 = arith.constant 0 : i32
    return %c0_i32, %c0_i32_0, %arg0 : i32, i32, i32
  }
  func.func @transform_8(%arg0: i32) -> (i32, i32) {
    %c0_i32 = arith.constant 0 : i32
    %c0_i32_0 = arith.constant 0 : i32
    return %c0_i32, %arg0 : i32, i32
  }
  func.func @transform_9(%arg0: i32) -> (i32, i32) {
    %c0_i32 = arith.constant 0 : i32
    %c0_i32_0 = arith.constant 0 : i32
    return %c0_i32, %arg0 : i32, i32
  }
}

</mosaic_0001>

<bundles_post_ra>
// kernel: tpu_custom_call.1
= control target key start
LH: loop header
LB: loop body
LE: loop exit
PB: predicated region body
PF: predicated region fallthrough
CT: control target
= control target key end

     0   :  { %15 = vsyncpa [#allocation3], 0  ;;  %v504_v2 = vmov 0   ;;  %s649_s0 = inlined_call_operand.vmem [shape: f32[1,128], index: 0, kind: input, shape index: {}]   ;;  %s650_s1 = inlined_call_operand.vmem [shape: f32[32,1], index: 1, kind: input, shape index: {}]   ;;  %s651_s2 = inlined_call_operand.vmem [shape: f32[32,1], index: 2, kind: input, shape index: {}]   ;;  %s652_s3 = inlined_call_operand.vmem [shape: f32[32,32], index: 3, kind: input, shape index: {}]   ;;  %s653_s4 = inlined_call_operand.vmem [shape: f32[32,1], index: 4, kind: input, shape index: {}]   ;;  %s654_s5 = inlined_call_operand.vmem [shape: f32[8,32], index: 5, kind: input, shape index: {}]   ;;  %s655_s6 = inlined_call_operand.vmem [shape: f32[8,1], index: 6, kind: input, shape index: {}]   ;;  %s656_s7 = inlined_call_operand.vmem [shape: f32[1,8,128], index: 7, kind: input, shape index: {}]   ;;  %s657_s8 = inlined_call_operand.hbm [shape: f32[8,128], index: 8, kind: output, shape index: {0}]   ;;  %s658_s9 = inlined_call_operand.hbm [shape: f32[8,128], index: 9, kind: output, shape index: {1}]  }
   0x1   :  { %v68_v0 = vld [vmem:[%s651_s2] sm:$0xff]  ;;  %447 = vset.pattern.permute.xlu1 %v504_v2  ;;  %446 = vset.pattern.permute.xlu0 %v504_v2  ;;  %v69_v3 = vld [vmem:[%s651_s2 + $0x8] sm:$0xff] }
   0x2   :  { %v33_v1 = vld [vmem:[%s650_s1] sm:$0xff]  ;;  %74 = vperm.xlu1 %447, %v68_v0   ;;  %v34_v4 = vld [vmem:[%s650_s1 + $0x8] sm:$0xff] }
   0x3   :  { %40 = vperm.xlu0 %446, %v33_v1  }
   0x4   :  { %16 = vsyncpa [#allocation5], 0  ;;  %v36_v5 = vld [vmem:[%s650_s1 + $0x18] sm:$0xff]  ;;  %v35_v6 = vld [vmem:[%s650_s1 + $0x10] sm:$0xff]  ;;  %vm128_vm0 = vcmask 261120   ;;  %v505_v41 = vmov 0.0|0.0  }
   0x5   :  { %v71_v7 = vld [vmem:[%s651_s2 + $0x18] sm:$0xff]  ;;  %v70_v8 = vld [vmem:[%s651_s2 + $0x10] sm:$0xff]  ;;  %v105_v9 = vld [vmem:[%s653_s4 + $0x8] sm:$0xff]  ;;  %434 = vmatprep.subr.bf16.mxu1 %v505_v41  ;;  %vm506_vm1 = vmmov 0   ;;  %v507_v42 = vmov 0.0   ;;  %s508_s21 = smov [#allocation4]  }
   0x6   :  { %79 = vperm.xlu1 %447, %v69_v3   ;;  %v104_v10 = vld [vmem:[%s653_s4] sm:$0xff]  ;;  %v107_v11 = vld [vmem:[%s653_s4 + $0x18] sm:$0xff]  ;;  %v106_v12 = vld [vmem:[%s653_s4 + $0x10] sm:$0xff]  ;;  %423 = vmatprep.mubr.msk.f32.mxu1 %vm506_vm1, %v507_v42  ;;  %s370_s22 = sshll.u32 %s508_s21, 4  ;;  %s371_s22 = int_to_ptr.vmem [resolvable:$true] %s370_s22 }
   0x7   :  { %45 = vperm.xlu0 %446, %v34_v4   ;;  %v100_v13 = vld [vmem:[%s652_s3] sm:$0xff]  ;;  %v101_v38 = vld [vmem:[%s652_s3 + $0x8] sm:$0xff]  ;;  %v102_v39 = vld [vmem:[%s652_s3 + $0x10] sm:$0xff]  ;;  %s456_s23 = scalar_lea.vmem %s371_s22, 128  ;;  %p461_p1 = scmp.lt.s32.totalorder %s371_s22, %s371_s22 }
   0x8   :  { %v231_v14 = vld [vmem:[%s655_s6] sm:$0xff]  ;;  %409 = vmatprep.mubr.msk.f32.mxu0 %vm128_vm0, %v100_v13  ;;  %v103_v40 = vld [vmem:[%s652_s3 + $0x18] sm:$0xff]  ;;  %p457_p0 = scmp.ne.s32.totalorder %s371_s22, %s456_s23  ;;  %p462_p2 = scmp.lt.s32.totalorder %s456_s23, %s456_s23 }
   0x9   :  { %v382_v15 = vld [vmem:[%s649_s0] ss:$0 sm:$0xff] }
   0xa   :  { %55 = vperm.xlu1 %447, %v36_v5   ;;  %v230_v61 = vld [vmem:[%s654_s5] sm:$0xff]  ;;  %p463_p3 = por %p462_p2, %p461_p1 }
   0xb   :  { %50 = vperm.xlu0 %446, %v35_v6  }
   0xc   :  { %p464_p4 = pnand %p463_p3, %p457_p0 }
   0xe   :  { %89 = vperm.xlu1 %447, %v71_v7  }
   0xf   :  { %84 = vperm.xlu0 %446, %v70_v8  }
  0x12   :  { %115 = vperm.xlu1 %447, %v105_v9  }
  0x13   :  { %110 = vperm.xlu0 %446, %v104_v10  }
  0x16   :  { %125 = vperm.xlu1 %447, %v107_v11  }
  0x17   :  { %120 = vperm.xlu0 %446, %v106_v12  }
  0x1b   :  { %234 = vperm.xlu0 %446, %v231_v14  }
  0x81   :  { %v75_v16 = vpop.permute.xlu1 %74 }
  0x82   :  { %v41_v17 = vpop.permute.xlu0 %40 }
  0x83   :  { %v64_v18 = vmul.f32 %v382_v15, %v41_v17 }
  0x85   :  { %v80_v19 = vpop.permute.xlu1 %79  ;;  %v92_v21 = vadd.f32 %v75_v16, %v64_v18 }
  0x86   :  { %v46_v20 = vpop.permute.xlu0 %45 }
  0x87   :  { %v65_v22 = vmul.f32 %v382_v15, %v46_v20  ;;  %v96_v26 = vmax.f32 %v92_v21, 0.0 }
  0x89   :  { %v93_v23 = vadd.f32 %v80_v19, %v65_v22  ;;  %v56_v24 = vpop.permute.xlu1 %55  ;;  %v331_v19 = vld [vmem:[%s656_s7] sm:$0xff] }
  0x8a   :  { %v51_v25 = vpop.permute.xlu0 %50  ;;  %v67_v28 = vmul.f32 %v382_v15, %v56_v24  ;;  %v332_v22 = vmul.f32 2.0, %v331_v19 }
  0x8b   :  { %v97_v27 = vmax.f32 %v93_v23, 0.0  ;;  %v66_v29 = vmul.f32 %v382_v15, %v51_v25 }
  0x8d   :  { %v426_v30 = vpack.c.bf16 %v97_v27, %v96_v26  ;;  %v90_v31 = vpop.permute.xlu1 %89 }
  0x8e   :  { %v85_v32 = vpop.permute.xlu0 %84  ;;  %v95_v33 = vadd.f32 %v90_v31, %v67_v28 }
  0x8f   :  { %v94_v34 = vadd.f32 %v85_v32, %v66_v29  ;;  %427 = vmatprep.subr.bf16.mxu0 %v426_v30 }
  0x90   :  { %429 = vmatpush3.bf16.msra.mxu0 %v426_v30  ;;  %v99_v35 = vmax.f32 %v95_v33, 0.0 }
  0x91   :  { %v98_v36 = vmax.f32 %v94_v34, 0.0  ;;  %v116_v43 = vpop.permute.xlu1 %115 }
  0x92   :  { %v111_v44 = vpop.permute.xlu0 %110 }
  0x93   :  { %v430_v37 = vpack.c.bf16 %v99_v35, %v98_v36 }
  0x95   :  { %431 = vmatprep.subr.bf16.mxu0 %v430_v37  ;;  %v126_v50 = vpop.permute.xlu1 %125 }
  0x96   :  { %433 = vmatpush3.bf16.msra.mxu0 %v430_v37  ;;  %v121_v53 = vpop.permute.xlu0 %120 }
  0x99   :  { %410 = vmatmul.mubr.msk.f32.vlgmr.msra.gmra.mrb[0].mxu0 %vm128_vm0, %v101_v38 }
  0x9a   :  { %412 = vmatprep.mubr.msk.f32.mxu0 %vm128_vm0, %v102_v39  ;;  %v235_v62 = vpop.permute.xlu0 %234 }
  0x9d   :  { %413 = vmatmul.mubr.msk.f32.gmra.mrb[2].mxu0 %vm128_vm0, %v103_v40 }
 0x16c   :  { %v411_v45 = vpop.f32.mrb[0].mxu0 }
 0x16d   :  { %v213_v46 = vadd.f32 %v411_v45, %v116_v43  ;;  %v207_v47 = vpop.f32.mrb[1].mxu0 }
 0x16e   :  { %v208_v48 = vadd.f32 %v207_v47, %v111_v44 }
 0x16f   :  { %v227_v49 = vmax.f32 %v213_v46, 0.0 }
 0x170   :  { %v226_v51 = vmax.f32 %v208_v48, 0.0  ;;  %v414_v52 = vpop.f32.mrb[2].mxu0 }
 0x171   :  { %v223_v54 = vadd.f32 %v414_v52, %v126_v50  ;;  %v217_v55 = vpop.f32.mrb[3].mxu0 }
 0x172   :  { %v218_v56 = vadd.f32 %v217_v55, %v121_v53  ;;  %v435_v57 = vpack.c.bf16 %v227_v49, %v226_v51 }
 0x173   :  { %v229_v58 = vmax.f32 %v223_v54, 0.0 }
 0x174   :  { %v228_v59 = vmax.f32 %v218_v56, 0.0  ;;  %436 = vmatpush3.bf16.msra.mxu1 %v435_v57 }
 0x175   :  { %437 = vmatprep.subr.bf16.mxu1 %v505_v41 }
 0x176   :  { %v438_v60 = vpack.c.bf16 %v229_v58, %v228_v59 }
 0x178   :  { %439 = vmatpush3.bf16.msra.mxu1 %v438_v60 }
 0x17b   :  { %424 = vmatmul.mubr.msk.f32.vlgmr.msra.gmra.mrb[0].mxu1 %vm128_vm0, %v230_v61 }
 0x24e   :  { %v306_v63 = vpop.f32.mrb[0].mxu1 }
 0x24f   :  { %v307_v0 = vadd.f32 %v306_v63, %v235_v62  ;;  %v425_v1 = vpop.f32.mrb[1].mxu1 }
 0x251   :  { %v310_v2 = vrot.slane %v307_v0, 4 }
 0x253   :  { %v311_v3 = vmax.f32 %v307_v0, %v310_v2 }
 0x255   :  { %v312_v4 = vrot.slane %v311_v3, 2 }
 0x257   :  { %v313_v5 = vmax.f32 %v311_v3, %v312_v4 }
 0x259   :  { %v314_v6 = vrot.slane %v313_v5, 1 }
 0x25b   :  { %v315_v7 = vmax.f32 %v313_v5, %v314_v6 }
 0x25d   :  { %v316_v8 = vsub.f32 %v307_v0, %v315_v7 }
 0x25f   :  { %v317_v9 = vmul.f32 1.442695, %v316_v8 }
 0x261   :  { %448 = vpow2.f32 %v317_v9 }
 0x26b   :  { %v449_v10 = vpop.eup %448 }
 0x26c   :  { %v319_v11 = vrot.slane %v449_v10, 4 }
 0x26e   :  { %v320_v12 = vadd.f32 %v449_v10, %v319_v11 }
 0x270   :  { %v321_v13 = vrot.slane %v320_v12, 2 }
 0x272   :  { %v322_v14 = vadd.f32 %v321_v13, %v320_v12 }
 0x274   :  { %v323_v15 = vrot.slane %v322_v14, 1 }
 0x276   :  { %v324_v16 = vadd.f32 %v323_v15, %v322_v14 }
 0x278   :  { %450 = vlog2.f32 %v324_v16 }
 0x282   :  { %v451_v17 = vpop.eup %450 }
 0x283   :  { %v326_v18 = vmul.f32 0.6931472, %v451_v17 }
 0x285   :  { %v327_v20 = vadd.f32 %v326_v18, %v315_v7 }
 0x287   :  { %v328_v21 = vsub.f32 %v307_v0, %v327_v20 }
 0x289   :  { %v330_v23 = vmul.f32 2.0, %v328_v21  ;;  %329 = vst [vmem:[#allocation4] sm:$0xff] %v328_v21 }
 0x28a   :  { %467 = shalt.err (!%p464_p4)
}
 0x28b   :  { %s468_s26 = scalar_lea.hbm %s658_s9, 128 }
 0x28c   :  { %p469_p5 = scmp.ne.s32.totalorder %s658_s9, %s468_s26  ;;  %p472_p6 = scmp.lt.u32.totalorder %s468_s26, %s658_s9 }
 0x28e   :  { %p474_p7 = pnand %p472_p6, %p469_p5 }
 0x290   :  { %477 = shalt.err (!%p474_p7)
}
 0x291   :  { %373 = dma.vmem_to_hbm [thread:$0]  %s371_s22, 128, %s658_s9, [#allocation5]   ;;  %v333_v24 = vadd.f32 %v332_v22, %v330_v23 }
 0x292   :  { %s509_s10 = smov [#allocation2]  }
 0x293   :  { %v334_v25 = vrot.slane %v333_v24, 4  ;;  %s360_s9 = sshll.u32 %s509_s10, 4  ;;  %s361_s9 = int_to_ptr.vmem [resolvable:$true] %s360_s9 }
 0x294   :  { %s478_s2 = scalar_lea.vmem %s361_s9, 128  ;;  %p483_p9 = scmp.lt.s32.totalorder %s361_s9, %s361_s9 }
 0x295   :  { %v335_v26 = vmax.f32 %v333_v24, %v334_v25  ;;  %p479_p8 = scmp.ne.s32.totalorder %s361_s9, %s478_s2  ;;  %p484_p10 = scmp.lt.s32.totalorder %s478_s2, %s478_s2 }
 0x297   :  { %v336_v27 = vrot.slane %v335_v26, 2  ;;  %p485_p11 = por %p484_p10, %p483_p9 }
 0x299   :  { %v337_v28 = vmax.f32 %v335_v26, %v336_v27  ;;  %p486_p12 = pnand %p485_p11, %p479_p8 }
 0x29b   :  { %v338_v29 = vrot.slane %v337_v28, 1 }
 0x29d   :  { %v339_v30 = vmax.f32 %v337_v28, %v338_v29 }
 0x29f   :  { %v340_v31 = vsub.f32 %v333_v24, %v339_v30 }
 0x2a1   :  { %v341_v32 = vmul.f32 1.442695, %v340_v31 }
 0x2a3   :  { %452 = vpow2.f32 %v341_v32 }
 0x2ad   :  { %v453_v33 = vpop.eup %452 }
 0x2ae   :  { %v343_v34 = vrot.slane %v453_v33, 4 }
 0x2b0   :  { %v344_v35 = vadd.f32 %v453_v33, %v343_v34 }
 0x2b2   :  { %v345_v36 = vrot.slane %v344_v35, 2 }
 0x2b4   :  { %v346_v37 = vadd.f32 %v345_v36, %v344_v35 }
 0x2b6   :  { %v347_v38 = vrot.slane %v346_v37, 1 }
 0x2b8   :  { %v348_v39 = vadd.f32 %v347_v38, %v346_v37 }
 0x2ba   :  { %454 = vrcp.f32 %v348_v39 }
 0x2c4   :  { %v455_v40 = vpop.eup %454 }
 0x2c5   :  { %v351_v41 = vmul.f32 %v455_v40, %v453_v33 }
 0x2c7   :  { %353 = vst [vmem:[#allocation2] sm:$0xff] %v351_v41 }
 0x2c8   :  { %489 = shalt.err (!%p486_p12)
}
 0x2c9   :  { %s490_s13 = scalar_lea.hbm %s657_s8, 128 }
 0x2ca   :  { %p491_p13 = scmp.ne.s32.totalorder %s657_s8, %s490_s13  ;;  %p494_p0 = scmp.lt.u32.totalorder %s490_s13, %s657_s8 }
 0x2cc   :  { %p496_p1 = pnand %p494_p0, %p491_p13 }
 0x2ce   :  { %499 = shalt.err (!%p496_p1)
}
 0x2cf   :  { %363 = dma.vmem_to_hbm [thread:$0]  %s361_s9, 128, %s657_s8, [#allocation3]  }
 0x2d0   :  { %500 = dma.done.wait [#allocation3], 128  }
 0x2d1   :  { %501 = vsyncadd [#allocation3], 4294967168 }
 0x2d2   :  { %502 = dma.done.wait [#allocation5], 128  }
 0x2d3   :  { %503 = vsyncadd [#allocation5], 4294967168 }
 0x2d4   :  { %380 = vsyncpa [#allocation3], 1 }
 0x2d5   :  { %381 = vsyncpa [#allocation5], 1 }

</bundles_post_ra>
